<compile_context>
chip_gen: v7x
topology: tpu7x:2x2x1
jax: 0.10.0
libtpu: 0.0.40
codegen_flags: <defaults>
</compile_context>

<pallas_src>
import math

import numpy as np
import jax
import jax.numpy as jnp
from jax.experimental import pallas as pl
from jax.experimental.pallas import tpu as pltpu  # noqa: F401  (kept for parity)

EPS = 1e-5


# ----------------------------------------------------------------------------
# MADE masks (deterministic: sequential input degrees, cyclic hidden degrees)
# ----------------------------------------------------------------------------
def made_masks(D, hidden_dims):
    degrees = [np.arange(D)]
    for H in hidden_dims:
        degrees.append(np.arange(H) % max(1, D - 1))
    masks = []
    for k in range(len(hidden_dims)):
        m_in, m_out = degrees[k], degrees[k + 1]
        masks.append((m_in[None, :] <= m_out[:, None]).astype(np.float32))  # (out,in)
    m_last = degrees[-1]
    m_out = np.arange(D)
    mo = (m_last[None, :] < m_out[:, None]).astype(np.float32)              # (D, H_last)
    masks.append(np.concatenate([mo, mo], axis=0))                          # (2D, H_last)
    return [jnp.asarray(m) for m in masks]


# ----------------------------------------------------------------------------
# Raw parameter init (deterministic, nn.Linear-style uniform; lg/beta zeros).
# Weights are pre-masked and pre-transposed so forward is x @ Wt + b.
# ----------------------------------------------------------------------------
def init_params(key, D, n_layers, hidden_dims):
    dims = [D] + list(hidden_dims) + [2 * D]
    masks = made_masks(D, hidden_dims)
    n_lin = len(dims) - 1
    keys = jax.random.split(key, n_layers * n_lin * 2)
    ki = 0
    Wts = [[] for _ in range(n_lin)]
    bs = [[] for _ in range(n_lin)]
    for _l in range(n_layers):
        for k in range(n_lin):
            fan_in, fan_out = dims[k], dims[k + 1]
            bound = 1.0 / math.sqrt(fan_in)
            W = jax.random.uniform(keys[ki], (fan_out, fan_in), jnp.float32,
                                   -bound, bound); ki += 1
            b = jax.random.uniform(keys[ki], (fan_out,), jnp.float32,
                                   -bound, bound); ki += 1
            Wts[k].append((W * masks[k]).T)          # (fan_in, fan_out)
            bs[k].append(b.reshape(1, fan_out))
    raw = []
    for k in range(n_lin):
        raw.append(jnp.stack(Wts[k]))                 # (L, fan_in, fan_out)
        raw.append(jnp.stack(bs[k]))                  # (L, 1, fan_out)
    raw.append(jnp.zeros((n_layers, 1, D), jnp.float32))  # log_gamma
    raw.append(jnp.zeros((n_layers, 1, D), jnp.float32))  # beta
    return raw


# ----------------------------------------------------------------------------
# Fold the per-layer feature reversal into the weights (zero runtime cost).
# The kernel carries c_l = flip^(l%2)(x_l). Folding rules:
#   - first masked weight of layer l:      row-flip       iff l%2 == 1
#   - mu / logp output weights & biases:   column-flip    iff l%2 == 1
#   - BN log_gamma / beta of layer l:      flip           iff (l+1)%2 == 1
# The per-layer flip of u then becomes a no-op in the carried representation;
# sums over features (log-det terms) are permutation-invariant.
# ----------------------------------------------------------------------------
def fold_params(raw, D, n_layers, hidden_dims):
    nh = len(hidden_dims)
    lg, beta = raw[-2], raw[-1]
    W0s, b0s = [], []
    Wmu_s, bmu_s, Wlp_s, blp_s = [], [], [], []
    lgf, betaf = [], []
    for l in range(n_layers):
        p_in = l % 2
        p_out = (l + 1) % 2
        W0, b0 = raw[0][l], raw[1][l]
        if p_in:
            W0 = W0[::-1, :]
        W0s.append(W0); b0s.append(b0)

        Wo = raw[2 * nh][l]        # (H_last, 2D)
        bo = raw[2 * nh + 1][l]    # (1, 2D)
        Wmu, Wlp = Wo[:, :D], Wo[:, D:]
        bmu, blp = bo[:, :D], bo[:, D:]
        if p_in:
            Wmu, Wlp = Wmu[:, ::-1], Wlp[:, ::-1]
            bmu, blp = bmu[:, ::-1], blp[:, ::-1]
        Wmu_s.append(Wmu); bmu_s.append(bmu)
        Wlp_s.append(Wlp); blp_s.append(blp)

        lgl, bl = lg[l], beta[l]
        if p_out:
            lgl, bl = lgl[:, ::-1], bl[:, ::-1]
        lgf.append(lgl); betaf.append(bl)

    params = [jnp.stack(W0s), jnp.stack(b0s)]
    for k in range(1, nh):                     # hidden-to-hidden linears unchanged
        params.append(raw[2 * k])
        params.append(raw[2 * k + 1])
    params += [jnp.stack(Wmu_s), jnp.stack(bmu_s),
               jnp.stack(Wlp_s), jnp.stack(blp_s),
               jnp.stack(lgf), jnp.stack(betaf)]
    return params


# ----------------------------------------------------------------------------
# Pallas kernel: single invocation, all layers unrolled, all weights resident
# in VMEM (no grid, no per-layer DMA, no scratch carry).
# ----------------------------------------------------------------------------
def make_kernel(n_layers, n_hidden, B, eps):
    n_p = 2 * n_hidden + 6
    inv_bm1 = 1.0 / float(B - 1)

    def kernel(x_ref, *refs):
        p = refs[:n_p]
        ox_ref, old_ref = refs[n_p], refs[n_p + 1]

        x = x_ref[...]                               # (B, D) f32
        ld = jnp.zeros((B, 1), jnp.float32)

        for l in range(n_layers):                    # statically unrolled
            # ---- MADE (masked MLP; flip pre-folded into weights) ----
            h = x
            for k in range(n_hidden):
                w = p[2 * k][l]                      # (in, out), pre-masked+T
                b = p[2 * k + 1][l]                  # (1, out)
                h = jnp.maximum(
                    jnp.dot(h, w, preferred_element_type=jnp.float32) + b, 0.0)

            base = 2 * n_hidden
            mu = jnp.dot(h, p[base][l],
                         preferred_element_type=jnp.float32) + p[base + 1][l]
            logp = jnp.dot(h, p[base + 2][l],
                           preferred_element_type=jnp.float32) + p[base + 3][l]

            # ---- MAFLayer transform (feature reversal is a no-op here) ----
            u = (x - mu) * jnp.exp(0.5 * logp)
            ld = ld + 0.5 * jnp.sum(logp, axis=1, keepdims=True)

            # ---- BatchNormLayer (training mode, two-pass unbiased var) ----
            lg = p[base + 4][l]                      # (1, D)
            bt = p[base + 5][l]                      # (1, D)
            mean = jnp.mean(u, axis=0, keepdims=True)                 # (1, D)
            d = u - mean
            var = jnp.sum(d * d, axis=0, keepdims=True) * inv_bm1     # (1, D)
            logs = lg - 0.5 * jnp.log(var + eps)                      # (1, D)
            x = d * jnp.exp(logs) + bt
            ld = ld + jnp.sum(logs, axis=1, keepdims=True)            # scalar bcast

        ox_ref[...] = x
        old_ref[...] = ld

    return kernel


def maf_forward(x, kparams, n_layers, hidden_dims, eps=EPS):
    B, D = x.shape
    assert B > 1, "unbiased BN variance requires batch size > 1"
    kernel = make_kernel(n_layers, len(hidden_dims), B, eps)

    # No grid: every input (x + all stacked, pre-folded params) is a single
    # whole-array VMEM block -> one DMA per tensor for the whole forward.
    out_shape = (jax.ShapeDtypeStruct((B, D), jnp.float32),
                 jax.ShapeDtypeStruct((B, 1), jnp.float32))
    y, ld = pl.pallas_call(kernel, out_shape=out_shape)(x, *kparams)

    if n_layers % 2 == 1:
        # carried representation has odd flip parity; undo once outside the kernel
        y = jnp.flip(y, axis=1)
    return y, ld[:, 0]


# ----------------------------------------------------------------------------
# Pure-JAX reference (mirrors PyTorch forward semantics, unfolded params)
# ----------------------------------------------------------------------------
def maf_ref(x, raw, n_layers, hidden_dims, eps=EPS):
    B, D = x.shape
    nh = len(hidden_dims)
    wb = raw[:2 * (nh + 1)]
    lg, beta = raw[-2], raw[-1]
    ld = jnp.zeros((B,), jnp.float32)
    for l in range(n_layers):
        h = x
        for k in range(nh):
            h = jnp.maximum(h @ wb[2 * k][l] + wb[2 * k + 1][l], 0.0)
        out = h @ wb[2 * nh][l] + wb[2 * nh + 1][l]
        mu, logp = out[:, :D], out[:, D:]
        u = (x - mu) * jnp.exp(0.5 * logp)
        u = jnp.flip(u, axis=1)
        ld = ld + 0.5 * jnp.sum(logp, axis=1)
        mean = jnp.mean(u, axis=0, keepdims=True)
        var = jnp.sum((u - mean) ** 2, axis=0, keepdims=True) / (B - 1)
        x_hat = (u - mean) / jnp.sqrt(var + eps)
        y = jnp.exp(lg[l]) * x_hat + beta[l]
        ld = ld + jnp.sum(lg[l] - 0.5 * jnp.log(var + eps))
        x = y
    return x, ld


if __name__ == "__main__":
    B, D = 8, 16
    n_layers = 3            # odd, to exercise the flip-parity folding path
    hidden_dims = [32, 32]

    key = jax.random.PRNGKey(0)
    kx, kp = jax.random.split(key)
    x = jax.random.normal(kx, (B, D), jnp.float32)
    raw = init_params(kp, D, n_layers, hidden_dims)
    kparams = fold_params(raw, D, n_layers, hidden_dims)

    y, ld = maf_forward(x, kparams, n_layers, hidden_dims)
    jax.block_until_ready((y, ld))

    yr, ldr = maf_ref(x, raw, n_layers, hidden_dims)
    assert y.shape == (B, D) and ld.shape == (B,)
    assert jnp.allclose(y, yr, atol=1e-3, rtol=1e-3), float(jnp.max(jnp.abs(y - yr)))
    assert jnp.allclose(ld, ldr, atol=1e-3, rtol=1e-3), float(jnp.max(jnp.abs(ld - ldr)))

    print("KERNEL_OK")
</pallas_src>

<mosaic_0001>
module attributes {stable_mosaic.version = 11 : i64} {
  func.func @kernel(%arg0: memref<8x16xf32, #tpu.memory_space<vmem>>, %arg1: memref<3x16x32xf32, #tpu.memory_space<vmem>>, %arg2: memref<3x1x32xf32, #tpu.memory_space<vmem>>, %arg3: memref<3x32x32xf32, #tpu.memory_space<vmem>>, %arg4: memref<3x1x32xf32, #tpu.memory_space<vmem>>, %arg5: memref<3x32x16xf32, #tpu.memory_space<vmem>>, %arg6: memref<3x1x16xf32, #tpu.memory_space<vmem>>, %arg7: memref<3x32x16xf32, #tpu.memory_space<vmem>>, %arg8: memref<3x1x16xf32, #tpu.memory_space<vmem>>, %arg9: memref<3x1x16xf32, #tpu.memory_space<vmem>>, %arg10: memref<3x1x16xf32, #tpu.memory_space<vmem>>, %arg11: memref<8x16xf32, #tpu.memory_space<vmem>>, %arg12: memref<8x1xf32, #tpu.memory_space<vmem>>) attributes {dimension_semantics = [], scalar_prefetch = 0 : i64, scratch_operands = 0 : i64, tpu.core_type = #tpu.core_type<tc>} {
    %c0 = arith.constant 0 : index
    %c0_0 = arith.constant 0 : index
    %0 = vector.load %arg0[%c0, %c0_0] : memref<8x16xf32, #tpu.memory_space<vmem>>, vector<8x16xf32>
    %cst = arith.constant 0.000000e+00 : f32
    %1 = vector.broadcast %cst : f32 to vector<8x1xf32>
    %c0_1 = arith.constant 0 : index
    %c0_2 = arith.constant 0 : index
    %c0_3 = arith.constant 0 : index
    %2 = vector.load %arg1[%c0_1, %c0_2, %c0_3] : memref<3x16x32xf32, #tpu.memory_space<vmem>>, vector<1x16x32xf32>
    %3 = vector.shape_cast %2 : vector<1x16x32xf32> to vector<16x32xf32>
    %c0_4 = arith.constant 0 : index
    %c0_5 = arith.constant 0 : index
    %c0_6 = arith.constant 0 : index
    %4 = vector.load %arg2[%c0_4, %c0_5, %c0_6] : memref<3x1x32xf32, #tpu.memory_space<vmem>>, vector<1x1x32xf32>
    %5 = vector.shape_cast %4 : vector<1x1x32xf32> to vector<1x32xf32>
    %cst_7 = arith.constant dense<0.000000e+00> : vector<8x32xf32>
    %6 = tpu.matmul %0, %3, %cst_7 {dimension_numbers = #tpu.dot_dimension_numbers<[1], [0], [0], [1], [0, 0, 1, 1], [], []>} : vector<8x16xf32>, vector<16x32xf32>, vector<8x32xf32> -> vector<8x32xf32>
    %7 = vector.broadcast %5 : vector<1x32xf32> to vector<8x32xf32>
    %8 = arith.addf %6, %7 : vector<8x32xf32>
    %cst_8 = arith.constant 0.000000e+00 : f32
    %9 = vector.broadcast %cst_8 : f32 to vector<8x32xf32>
    %10 = arith.maximumf %8, %9 : vector<8x32xf32>
    %c0_9 = arith.constant 0 : index
    %c0_10 = arith.constant 0 : index
    %c0_11 = arith.constant 0 : index
    %11 = vector.load %arg3[%c0_9, %c0_10, %c0_11] : memref<3x32x32xf32, #tpu.memory_space<vmem>>, vector<1x32x32xf32>
    %12 = vector.shape_cast %11 : vector<1x32x32xf32> to vector<32x32xf32>
    %c0_12 = arith.constant 0 : index
    %c0_13 = arith.constant 0 : index
    %c0_14 = arith.constant 0 : index
    %13 = vector.load %arg4[%c0_12, %c0_13, %c0_14] : memref<3x1x32xf32, #tpu.memory_space<vmem>>, vector<1x1x32xf32>
    %14 = vector.shape_cast %13 : vector<1x1x32xf32> to vector<1x32xf32>
    %cst_15 = arith.constant dense<0.000000e+00> : vector<8x32xf32>
    %15 = tpu.matmul %10, %12, %cst_15 {dimension_numbers = #tpu.dot_dimension_numbers<[1], [0], [0], [1], [0, 0, 1, 1], [], []>} : vector<8x32xf32>, vector<32x32xf32>, vector<8x32xf32> -> vector<8x32xf32>
    %16 = vector.broadcast %14 : vector<1x32xf32> to vector<8x32xf32>
    %17 = arith.addf %15, %16 : vector<8x32xf32>
    %cst_16 = arith.constant 0.000000e+00 : f32
    %18 = vector.broadcast %cst_16 : f32 to vector<8x32xf32>
    %19 = arith.maximumf %17, %18 : vector<8x32xf32>
    %c0_17 = arith.constant 0 : index
    %c0_18 = arith.constant 0 : index
    %c0_19 = arith.constant 0 : index
    %20 = vector.load %arg5[%c0_17, %c0_18, %c0_19] : memref<3x32x16xf32, #tpu.memory_space<vmem>>, vector<1x32x16xf32>
    %21 = vector.shape_cast %20 : vector<1x32x16xf32> to vector<32x16xf32>
    %cst_20 = arith.constant dense<0.000000e+00> : vector<8x16xf32>
    %22 = tpu.matmul %19, %21, %cst_20 {dimension_numbers = #tpu.dot_dimension_numbers<[1], [0], [0], [1], [0, 0, 1, 1], [], []>} : vector<8x32xf32>, vector<32x16xf32>, vector<8x16xf32> -> vector<8x16xf32>
    %c0_21 = arith.constant 0 : index
    %c0_22 = arith.constant 0 : index
    %c0_23 = arith.constant 0 : index
    %23 = vector.load %arg6[%c0_21, %c0_22, %c0_23] : memref<3x1x16xf32, #tpu.memory_space<vmem>>, vector<1x1x16xf32>
    %24 = vector.shape_cast %23 : vector<1x1x16xf32> to vector<1x16xf32>
    %25 = vector.broadcast %24 : vector<1x16xf32> to vector<8x16xf32>
    %26 = arith.addf %22, %25 : vector<8x16xf32>
    %c0_24 = arith.constant 0 : index
    %c0_25 = arith.constant 0 : index
    %c0_26 = arith.constant 0 : index
    %27 = vector.load %arg7[%c0_24, %c0_25, %c0_26] : memref<3x32x16xf32, #tpu.memory_space<vmem>>, vector<1x32x16xf32>
    %28 = vector.shape_cast %27 : vector<1x32x16xf32> to vector<32x16xf32>
    %cst_27 = arith.constant dense<0.000000e+00> : vector<8x16xf32>
    %29 = tpu.matmul %19, %28, %cst_27 {dimension_numbers = #tpu.dot_dimension_numbers<[1], [0], [0], [1], [0, 0, 1, 1], [], []>} : vector<8x32xf32>, vector<32x16xf32>, vector<8x16xf32> -> vector<8x16xf32>
    %c0_28 = arith.constant 0 : index
    %c0_29 = arith.constant 0 : index
    %c0_30 = arith.constant 0 : index
    %30 = vector.load %arg8[%c0_28, %c0_29, %c0_30] : memref<3x1x16xf32, #tpu.memory_space<vmem>>, vector<1x1x16xf32>
    %31 = vector.shape_cast %30 : vector<1x1x16xf32> to vector<1x16xf32>
    %32 = vector.broadcast %31 : vector<1x16xf32> to vector<8x16xf32>
    %33 = arith.addf %29, %32 : vector<8x16xf32>
    %34 = arith.subf %0, %26 : vector<8x16xf32>
    %cst_31 = arith.constant 5.000000e-01 : f32
    %35 = vector.broadcast %cst_31 : f32 to vector<8x16xf32>
    %36 = arith.mulf %35, %33 : vector<8x16xf32>
    %37 = math.exp %36 : vector<8x16xf32>
    %38 = arith.mulf %34, %37 : vector<8x16xf32>
    %cst_32 = arith.constant dense<0.000000e+00> : vector<8xf32>
    %39 = vector.multi_reduction <add>, %33, %cst_32 [1] : vector<8x16xf32> to vector<8xf32>
    %40 = vector.shape_cast %39 : vector<8xf32> to vector<8x1xf32>
    %cst_33 = arith.constant 5.000000e-01 : f32
    %41 = vector.broadcast %cst_33 : f32 to vector<8x1xf32>
    %42 = arith.mulf %41, %40 : vector<8x1xf32>
    %43 = arith.addf %1, %42 : vector<8x1xf32>
    %c0_34 = arith.constant 0 : index
    %c0_35 = arith.constant 0 : index
    %c0_36 = arith.constant 0 : index
    %44 = vector.load %arg9[%c0_34, %c0_35, %c0_36] : memref<3x1x16xf32, #tpu.memory_space<vmem>>, vector<1x1x16xf32>
    %45 = vector.shape_cast %44 : vector<1x1x16xf32> to vector<1x16xf32>
    %c0_37 = arith.constant 0 : index
    %c0_38 = arith.constant 0 : index
    %c0_39 = arith.constant 0 : index
    %46 = vector.load %arg10[%c0_37, %c0_38, %c0_39] : memref<3x1x16xf32, #tpu.memory_space<vmem>>, vector<1x1x16xf32>
    %47 = vector.shape_cast %46 : vector<1x1x16xf32> to vector<1x16xf32>
    %cst_40 = arith.constant dense<0.000000e+00> : vector<16xf32>
    %48 = vector.multi_reduction <add>, %38, %cst_40 [0] : vector<8x16xf32> to vector<16xf32>
    %49 = vector.shape_cast %48 : vector<16xf32> to vector<1x16xf32>
    %cst_41 = arith.constant 8.000000e+00 : f32
    %50 = vector.broadcast %cst_41 : f32 to vector<1x16xf32>
    %51 = arith.divf %49, %50 : vector<1x16xf32>
    %52 = vector.broadcast %51 : vector<1x16xf32> to vector<8x16xf32>
    %53 = arith.subf %38, %52 : vector<8x16xf32>
    %54 = arith.mulf %53, %53 : vector<8x16xf32>
    %cst_42 = arith.constant dense<0.000000e+00> : vector<16xf32>
    %55 = vector.multi_reduction <add>, %54, %cst_42 [0] : vector<8x16xf32> to vector<16xf32>
    %56 = vector.shape_cast %55 : vector<16xf32> to vector<1x16xf32>
    %cst_43 = arith.constant 0.142857149 : f32
    %57 = vector.broadcast %cst_43 : f32 to vector<1x16xf32>
    %58 = arith.mulf %56, %57 : vector<1x16xf32>
    %cst_44 = arith.constant 9.99999974E-6 : f32
    %59 = vector.broadcast %cst_44 : f32 to vector<1x16xf32>
    %60 = arith.addf %58, %59 : vector<1x16xf32>
    %61 = math.log %60 : vector<1x16xf32>
    %cst_45 = arith.constant 5.000000e-01 : f32
    %62 = vector.broadcast %cst_45 : f32 to vector<1x16xf32>
    %63 = arith.mulf %62, %61 : vector<1x16xf32>
    %64 = arith.subf %45, %63 : vector<1x16xf32>
    %65 = math.exp %64 : vector<1x16xf32>
    %66 = vector.broadcast %65 : vector<1x16xf32> to vector<8x16xf32>
    %67 = arith.mulf %53, %66 : vector<8x16xf32>
    %68 = vector.broadcast %47 : vector<1x16xf32> to vector<8x16xf32>
    %69 = arith.addf %67, %68 : vector<8x16xf32>
    %cst_46 = arith.constant dense<0.000000e+00> : vector<1xf32>
    %70 = vector.multi_reduction <add>, %64, %cst_46 [1] : vector<1x16xf32> to vector<1xf32>
    %71 = vector.shape_cast %70 : vector<1xf32> to vector<1x1xf32>
    %72 = vector.broadcast %71 : vector<1x1xf32> to vector<8x1xf32>
    %73 = arith.addf %43, %72 : vector<8x1xf32>
    %c1 = arith.constant 1 : index
    %c0_47 = arith.constant 0 : index
    %c0_48 = arith.constant 0 : index
    %74 = vector.load %arg1[%c1, %c0_47, %c0_48] : memref<3x16x32xf32, #tpu.memory_space<vmem>>, vector<1x16x32xf32>
    %75 = vector.shape_cast %74 : vector<1x16x32xf32> to vector<16x32xf32>
    %c1_49 = arith.constant 1 : index
    %c0_50 = arith.constant 0 : index
    %c0_51 = arith.constant 0 : index
    %76 = vector.load %arg2[%c1_49, %c0_50, %c0_51] : memref<3x1x32xf32, #tpu.memory_space<vmem>>, vector<1x1x32xf32>
    %77 = vector.shape_cast %76 : vector<1x1x32xf32> to vector<1x32xf32>
    %cst_52 = arith.constant dense<0.000000e+00> : vector<8x32xf32>
    %78 = tpu.matmul %69, %75, %cst_52 {dimension_numbers = #tpu.dot_dimension_numbers<[1], [0], [0], [1], [0, 0, 1, 1], [], []>} : vector<8x16xf32>, vector<16x32xf32>, vector<8x32xf32> -> vector<8x32xf32>
    %79 = vector.broadcast %77 : vector<1x32xf32> to vector<8x32xf32>
    %80 = arith.addf %78, %79 : vector<8x32xf32>
    %cst_53 = arith.constant 0.000000e+00 : f32
    %81 = vector.broadcast %cst_53 : f32 to vector<8x32xf32>
    %82 = arith.maximumf %80, %81 : vector<8x32xf32>
    %c1_54 = arith.constant 1 : index
    %c0_55 = arith.constant 0 : index
    %c0_56 = arith.constant 0 : index
    %83 = vector.load %arg3[%c1_54, %c0_55, %c0_56] : memref<3x32x32xf32, #tpu.memory_space<vmem>>, vector<1x32x32xf32>
    %84 = vector.shape_cast %83 : vector<1x32x32xf32> to vector<32x32xf32>
    %c1_57 = arith.constant 1 : index
    %c0_58 = arith.constant 0 : index
    %c0_59 = arith.constant 0 : index
    %85 = vector.load %arg4[%c1_57, %c0_58, %c0_59] : memref<3x1x32xf32, #tpu.memory_space<vmem>>, vector<1x1x32xf32>
    %86 = vector.shape_cast %85 : vector<1x1x32xf32> to vector<1x32xf32>
    %cst_60 = arith.constant dense<0.000000e+00> : vector<8x32xf32>
    %87 = tpu.matmul %82, %84, %cst_60 {dimension_numbers = #tpu.dot_dimension_numbers<[1], [0], [0], [1], [0, 0, 1, 1], [], []>} : vector<8x32xf32>, vector<32x32xf32>, vector<8x32xf32> -> vector<8x32xf32>
    %88 = vector.broadcast %86 : vector<1x32xf32> to vector<8x32xf32>
    %89 = arith.addf %87, %88 : vector<8x32xf32>
    %cst_61 = arith.constant 0.000000e+00 : f32
    %90 = vector.broadcast %cst_61 : f32 to vector<8x32xf32>
    %91 = arith.maximumf %89, %90 : vector<8x32xf32>
    %c1_62 = arith.constant 1 : index
    %c0_63 = arith.constant 0 : index
    %c0_64 = arith.constant 0 : index
    %92 = vector.load %arg5[%c1_62, %c0_63, %c0_64] : memref<3x32x16xf32, #tpu.memory_space<vmem>>, vector<1x32x16xf32>
    %93 = vector.shape_cast %92 : vector<1x32x16xf32> to vector<32x16xf32>
    %cst_65 = arith.constant dense<0.000000e+00> : vector<8x16xf32>
    %94 = tpu.matmul %91, %93, %cst_65 {dimension_numbers = #tpu.dot_dimension_numbers<[1], [0], [0], [1], [0, 0, 1, 1], [], []>} : vector<8x32xf32>, vector<32x16xf32>, vector<8x16xf32> -> vector<8x16xf32>
    %c1_66 = arith.constant 1 : index
    %c0_67 = arith.constant 0 : index
    %c0_68 = arith.constant 0 : index
    %95 = vector.load %arg6[%c1_66, %c0_67, %c0_68] : memref<3x1x16xf32, #tpu.memory_space<vmem>>, vector<1x1x16xf32>
    %96 = vector.shape_cast %95 : vector<1x1x16xf32> to vector<1x16xf32>
    %97 = vector.broadcast %96 : vector<1x16xf32> to vector<8x16xf32>
    %98 = arith.addf %94, %97 : vector<8x16xf32>
    %c1_69 = arith.constant 1 : index
    %c0_70 = arith.constant 0 : index
    %c0_71 = arith.constant 0 : index
    %99 = vector.load %arg7[%c1_69, %c0_70, %c0_71] : memref<3x32x16xf32, #tpu.memory_space<vmem>>, vector<1x32x16xf32>
    %100 = vector.shape_cast %99 : vector<1x32x16xf32> to vector<32x16xf32>
    %cst_72 = arith.constant dense<0.000000e+00> : vector<8x16xf32>
    %101 = tpu.matmul %91, %100, %cst_72 {dimension_numbers = #tpu.dot_dimension_numbers<[1], [0], [0], [1], [0, 0, 1, 1], [], []>} : vector<8x32xf32>, vector<32x16xf32>, vector<8x16xf32> -> vector<8x16xf32>
    %c1_73 = arith.constant 1 : index
    %c0_74 = arith.constant 0 : index
    %c0_75 = arith.constant 0 : index
    %102 = vector.load %arg8[%c1_73, %c0_74, %c0_75] : memref<3x1x16xf32, #tpu.memory_space<vmem>>, vector<1x1x16xf32>
    %103 = vector.shape_cast %102 : vector<1x1x16xf32> to vector<1x16xf32>
    %104 = vector.broadcast %103 : vector<1x16xf32> to vector<8x16xf32>
    %105 = arith.addf %101, %104 : vector<8x16xf32>
    %106 = arith.subf %69, %98 : vector<8x16xf32>
    %cst_76 = arith.constant 5.000000e-01 : f32
    %107 = vector.broadcast %cst_76 : f32 to vector<8x16xf32>
    %108 = arith.mulf %107, %105 : vector<8x16xf32>
    %109 = math.exp %108 : vector<8x16xf32>
    %110 = arith.mulf %106, %109 : vector<8x16xf32>
    %cst_77 = arith.constant dense<0.000000e+00> : vector<8xf32>
    %111 = vector.multi_reduction <add>, %105, %cst_77 [1] : vector<8x16xf32> to vector<8xf32>
    %112 = vector.shape_cast %111 : vector<8xf32> to vector<8x1xf32>
    %cst_78 = arith.constant 5.000000e-01 : f32
    %113 = vector.broadcast %cst_78 : f32 to vector<8x1xf32>
    %114 = arith.mulf %113, %112 : vector<8x1xf32>
    %115 = arith.addf %73, %114 : vector<8x1xf32>
    %c1_79 = arith.constant 1 : index
    %c0_80 = arith.constant 0 : index
    %c0_81 = arith.constant 0 : index
    %116 = vector.load %arg9[%c1_79, %c0_80, %c0_81] : memref<3x1x16xf32, #tpu.memory_space<vmem>>, vector<1x1x16xf32>
    %117 = vector.shape_cast %116 : vector<1x1x16xf32> to vector<1x16xf32>
    %c1_82 = arith.constant 1 : index
    %c0_83 = arith.constant 0 : index
    %c0_84 = arith.constant 0 : index
    %118 = vector.load %arg10[%c1_82, %c0_83, %c0_84] : memref<3x1x16xf32, #tpu.memory_space<vmem>>, vector<1x1x16xf32>
    %119 = vector.shape_cast %118 : vector<1x1x16xf32> to vector<1x16xf32>
    %cst_85 = arith.constant dense<0.000000e+00> : vector<16xf32>
    %120 = vector.multi_reduction <add>, %110, %cst_85 [0] : vector<8x16xf32> to vector<16xf32>
    %121 = vector.shape_cast %120 : vector<16xf32> to vector<1x16xf32>
    %cst_86 = arith.constant 8.000000e+00 : f32
    %122 = vector.broadcast %cst_86 : f32 to vector<1x16xf32>
    %123 = arith.divf %121, %122 : vector<1x16xf32>
    %124 = vector.broadcast %123 : vector<1x16xf32> to vector<8x16xf32>
    %125 = arith.subf %110, %124 : vector<8x16xf32>
    %126 = arith.mulf %125, %125 : vector<8x16xf32>
    %cst_87 = arith.constant dense<0.000000e+00> : vector<16xf32>
    %127 = vector.multi_reduction <add>, %126, %cst_87 [0] : vector<8x16xf32> to vector<16xf32>
    %128 = vector.shape_cast %127 : vector<16xf32> to vector<1x16xf32>
    %cst_88 = arith.constant 0.142857149 : f32
    %129 = vector.broadcast %cst_88 : f32 to vector<1x16xf32>
    %130 = arith.mulf %128, %129 : vector<1x16xf32>
    %cst_89 = arith.constant 9.99999974E-6 : f32
    %131 = vector.broadcast %cst_89 : f32 to vector<1x16xf32>
    %132 = arith.addf %130, %131 : vector<1x16xf32>
    %133 = math.log %132 : vector<1x16xf32>
    %cst_90 = arith.constant 5.000000e-01 : f32
    %134 = vector.broadcast %cst_90 : f32 to vector<1x16xf32>
    %135 = arith.mulf %134, %133 : vector<1x16xf32>
    %136 = arith.subf %117, %135 : vector<1x16xf32>
    %137 = math.exp %136 : vector<1x16xf32>
    %138 = vector.broadcast %137 : vector<1x16xf32> to vector<8x16xf32>
    %139 = arith.mulf %125, %138 : vector<8x16xf32>
    %140 = vector.broadcast %119 : vector<1x16xf32> to vector<8x16xf32>
    %141 = arith.addf %139, %140 : vector<8x16xf32>
    %cst_91 = arith.constant dense<0.000000e+00> : vector<1xf32>
    %142 = vector.multi_reduction <add>, %136, %cst_91 [1] : vector<1x16xf32> to vector<1xf32>
    %143 = vector.shape_cast %142 : vector<1xf32> to vector<1x1xf32>
    %144 = vector.broadcast %143 : vector<1x1xf32> to vector<8x1xf32>
    %145 = arith.addf %115, %144 : vector<8x1xf32>
    %c2 = arith.constant 2 : index
    %c0_92 = arith.constant 0 : index
    %c0_93 = arith.constant 0 : index
    %146 = vector.load %arg1[%c2, %c0_92, %c0_93] : memref<3x16x32xf32, #tpu.memory_space<vmem>>, vector<1x16x32xf32>
    %147 = vector.shape_cast %146 : vector<1x16x32xf32> to vector<16x32xf32>
    %c2_94 = arith.constant 2 : index
    %c0_95 = arith.constant 0 : index
    %c0_96 = arith.constant 0 : index
    %148 = vector.load %arg2[%c2_94, %c0_95, %c0_96] : memref<3x1x32xf32, #tpu.memory_space<vmem>>, vector<1x1x32xf32>
    %149 = vector.shape_cast %148 : vector<1x1x32xf32> to vector<1x32xf32>
    %cst_97 = arith.constant dense<0.000000e+00> : vector<8x32xf32>
    %150 = tpu.matmul %141, %147, %cst_97 {dimension_numbers = #tpu.dot_dimension_numbers<[1], [0], [0], [1], [0, 0, 1, 1], [], []>} : vector<8x16xf32>, vector<16x32xf32>, vector<8x32xf32> -> vector<8x32xf32>
    %151 = vector.broadcast %149 : vector<1x32xf32> to vector<8x32xf32>
    %152 = arith.addf %150, %151 : vector<8x32xf32>
    %cst_98 = arith.constant 0.000000e+00 : f32
    %153 = vector.broadcast %cst_98 : f32 to vector<8x32xf32>
    %154 = arith.maximumf %152, %153 : vector<8x32xf32>
    %c2_99 = arith.constant 2 : index
    %c0_100 = arith.constant 0 : index
    %c0_101 = arith.constant 0 : index
    %155 = vector.load %arg3[%c2_99, %c0_100, %c0_101] : memref<3x32x32xf32, #tpu.memory_space<vmem>>, vector<1x32x32xf32>
    %156 = vector.shape_cast %155 : vector<1x32x32xf32> to vector<32x32xf32>
    %c2_102 = arith.constant 2 : index
    %c0_103 = arith.constant 0 : index
    %c0_104 = arith.constant 0 : index
    %157 = vector.load %arg4[%c2_102, %c0_103, %c0_104] : memref<3x1x32xf32, #tpu.memory_space<vmem>>, vector<1x1x32xf32>
    %158 = vector.shape_cast %157 : vector<1x1x32xf32> to vector<1x32xf32>
    %cst_105 = arith.constant dense<0.000000e+00> : vector<8x32xf32>
    %159 = tpu.matmul %154, %156, %cst_105 {dimension_numbers = #tpu.dot_dimension_numbers<[1], [0], [0], [1], [0, 0, 1, 1], [], []>} : vector<8x32xf32>, vector<32x32xf32>, vector<8x32xf32> -> vector<8x32xf32>
    %160 = vector.broadcast %158 : vector<1x32xf32> to vector<8x32xf32>
    %161 = arith.addf %159, %160 : vector<8x32xf32>
    %cst_106 = arith.constant 0.000000e+00 : f32
    %162 = vector.broadcast %cst_106 : f32 to vector<8x32xf32>
    %163 = arith.maximumf %161, %162 : vector<8x32xf32>
    %c2_107 = arith.constant 2 : index
    %c0_108 = arith.constant 0 : index
    %c0_109 = arith.constant 0 : index
    %164 = vector.load %arg5[%c2_107, %c0_108, %c0_109] : memref<3x32x16xf32, #tpu.memory_space<vmem>>, vector<1x32x16xf32>
    %165 = vector.shape_cast %164 : vector<1x32x16xf32> to vector<32x16xf32>
    %cst_110 = arith.constant dense<0.000000e+00> : vector<8x16xf32>
    %166 = tpu.matmul %163, %165, %cst_110 {dimension_numbers = #tpu.dot_dimension_numbers<[1], [0], [0], [1], [0, 0, 1, 1], [], []>} : vector<8x32xf32>, vector<32x16xf32>, vector<8x16xf32> -> vector<8x16xf32>
    %c2_111 = arith.constant 2 : index
    %c0_112 = arith.constant 0 : index
    %c0_113 = arith.constant 0 : index
    %167 = vector.load %arg6[%c2_111, %c0_112, %c0_113] : memref<3x1x16xf32, #tpu.memory_space<vmem>>, vector<1x1x16xf32>
    %168 = vector.shape_cast %167 : vector<1x1x16xf32> to vector<1x16xf32>
    %169 = vector.broadcast %168 : vector<1x16xf32> to vector<8x16xf32>
    %170 = arith.addf %166, %169 : vector<8x16xf32>
    %c2_114 = arith.constant 2 : index
    %c0_115 = arith.constant 0 : index
    %c0_116 = arith.constant 0 : index
    %171 = vector.load %arg7[%c2_114, %c0_115, %c0_116] : memref<3x32x16xf32, #tpu.memory_space<vmem>>, vector<1x32x16xf32>
    %172 = vector.shape_cast %171 : vector<1x32x16xf32> to vector<32x16xf32>
    %cst_117 = arith.constant dense<0.000000e+00> : vector<8x16xf32>
    %173 = tpu.matmul %163, %172, %cst_117 {dimension_numbers = #tpu.dot_dimension_numbers<[1], [0], [0], [1], [0, 0, 1, 1], [], []>} : vector<8x32xf32>, vector<32x16xf32>, vector<8x16xf32> -> vector<8x16xf32>
    %c2_118 = arith.constant 2 : index
    %c0_119 = arith.constant 0 : index
    %c0_120 = arith.constant 0 : index
    %174 = vector.load %arg8[%c2_118, %c0_119, %c0_120] : memref<3x1x16xf32, #tpu.memory_space<vmem>>, vector<1x1x16xf32>
    %175 = vector.shape_cast %174 : vector<1x1x16xf32> to vector<1x16xf32>
    %176 = vector.broadcast %175 : vector<1x16xf32> to vector<8x16xf32>
    %177 = arith.addf %173, %176 : vector<8x16xf32>
    %178 = arith.subf %141, %170 : vector<8x16xf32>
    %cst_121 = arith.constant 5.000000e-01 : f32
    %179 = vector.broadcast %cst_121 : f32 to vector<8x16xf32>
    %180 = arith.mulf %179, %177 : vector<8x16xf32>
    %181 = math.exp %180 : vector<8x16xf32>
    %182 = arith.mulf %178, %181 : vector<8x16xf32>
    %cst_122 = arith.constant dense<0.000000e+00> : vector<8xf32>
    %183 = vector.multi_reduction <add>, %177, %cst_122 [1] : vector<8x16xf32> to vector<8xf32>
    %184 = vector.shape_cast %183 : vector<8xf32> to vector<8x1xf32>
    %cst_123 = arith.constant 5.000000e-01 : f32
    %185 = vector.broadcast %cst_123 : f32 to vector<8x1xf32>
    %186 = arith.mulf %185, %184 : vector<8x1xf32>
    %187 = arith.addf %145, %186 : vector<8x1xf32>
    %c2_124 = arith.constant 2 : index
    %c0_125 = arith.constant 0 : index
    %c0_126 = arith.constant 0 : index
    %188 = vector.load %arg9[%c2_124, %c0_125, %c0_126] : memref<3x1x16xf32, #tpu.memory_space<vmem>>, vector<1x1x16xf32>
    %189 = vector.shape_cast %188 : vector<1x1x16xf32> to vector<1x16xf32>
    %c2_127 = arith.constant 2 : index
    %c0_128 = arith.constant 0 : index
    %c0_129 = arith.constant 0 : index
    %190 = vector.load %arg10[%c2_127, %c0_128, %c0_129] : memref<3x1x16xf32, #tpu.memory_space<vmem>>, vector<1x1x16xf32>
    %191 = vector.shape_cast %190 : vector<1x1x16xf32> to vector<1x16xf32>
    %cst_130 = arith.constant dense<0.000000e+00> : vector<16xf32>
    %192 = vector.multi_reduction <add>, %182, %cst_130 [0] : vector<8x16xf32> to vector<16xf32>
    %193 = vector.shape_cast %192 : vector<16xf32> to vector<1x16xf32>
    %cst_131 = arith.constant 8.000000e+00 : f32
    %194 = vector.broadcast %cst_131 : f32 to vector<1x16xf32>
    %195 = arith.divf %193, %194 : vector<1x16xf32>
    %196 = vector.broadcast %195 : vector<1x16xf32> to vector<8x16xf32>
    %197 = arith.subf %182, %196 : vector<8x16xf32>
    %198 = arith.mulf %197, %197 : vector<8x16xf32>
    %cst_132 = arith.constant dense<0.000000e+00> : vector<16xf32>
    %199 = vector.multi_reduction <add>, %198, %cst_132 [0] : vector<8x16xf32> to vector<16xf32>
    %200 = vector.shape_cast %199 : vector<16xf32> to vector<1x16xf32>
    %cst_133 = arith.constant 0.142857149 : f32
    %201 = vector.broadcast %cst_133 : f32 to vector<1x16xf32>
    %202 = arith.mulf %200, %201 : vector<1x16xf32>
    %cst_134 = arith.constant 9.99999974E-6 : f32
    %203 = vector.broadcast %cst_134 : f32 to vector<1x16xf32>
    %204 = arith.addf %202, %203 : vector<1x16xf32>
    %205 = math.log %204 : vector<1x16xf32>
    %cst_135 = arith.constant 5.000000e-01 : f32
    %206 = vector.broadcast %cst_135 : f32 to vector<1x16xf32>
    %207 = arith.mulf %206, %205 : vector<1x16xf32>
    %208 = arith.subf %189, %207 : vector<1x16xf32>
    %209 = math.exp %208 : vector<1x16xf32>
    %210 = vector.broadcast %209 : vector<1x16xf32> to vector<8x16xf32>
    %211 = arith.mulf %197, %210 : vector<8x16xf32>
    %212 = vector.broadcast %191 : vector<1x16xf32> to vector<8x16xf32>
    %213 = arith.addf %211, %212 : vector<8x16xf32>
    %cst_136 = arith.constant dense<0.000000e+00> : vector<1xf32>
    %214 = vector.multi_reduction <add>, %208, %cst_136 [1] : vector<1x16xf32> to vector<1xf32>
    %215 = vector.shape_cast %214 : vector<1xf32> to vector<1x1xf32>
    %216 = vector.broadcast %215 : vector<1x1xf32> to vector<8x1xf32>
    %217 = arith.addf %187, %216 : vector<8x1xf32>
    %c0_137 = arith.constant 0 : index
    %c0_138 = arith.constant 0 : index
    %218 = vector.load %arg11[%c0_137, %c0_138] : memref<8x16xf32, #tpu.memory_space<vmem>>, vector<8x16xf32>
    tpu.vector_store %arg11[%c0_137, %c0_138], %213 {strides = array<i32>} : memref<8x16xf32, #tpu.memory_space<vmem>>, vector<8x16xf32>,
    %c0_139 = arith.constant 0 : index
    %c0_140 = arith.constant 0 : index
    %219 = vector.load %arg12[%c0_139, %c0_140] : memref<8x1xf32, #tpu.memory_space<vmem>>, vector<8x1xf32>
    tpu.vector_store %arg12[%c0_139, %c0_140], %217 {strides = array<i32>} : memref<8x1xf32, #tpu.memory_space<vmem>>, vector<8x1xf32>,
    return
  }
}

</mosaic_0001>

<bundles_post_ra>
// kernel: tpu_custom_call.1
= control target key start
LH: loop header
LB: loop body
LE: loop exit
PB: predicated region body
PF: predicated region fallthrough
CT: control target
= control target key end

     0   :  { %v1613_v2 = vmov 0.0|0.0   ;;  %vm1614_vm0 = vmmov 0   ;;  %v1615_v4 = vmov 0.0   ;;  %s1966_s0 = inlined_call_operand.vmem [shape: f32[8,16], index: 0, kind: input, shape index: {}]   ;;  %s1967_s1 = inlined_call_operand.vmem [shape: f32[3,16,32], index: 1, kind: input, shape index: {}]   ;;  %s1968_s2 = inlined_call_operand.vmem [shape: f32[3,1,32], index: 2, kind: input, shape index: {}]   ;;  %s1969_s3 = inlined_call_operand.vmem [shape: f32[3,32,32], index: 3, kind: input, shape index: {}]   ;;  %s1970_s4 = inlined_call_operand.vmem [shape: f32[3,1,32], index: 4, kind: input, shape index: {}]   ;;  %s1971_s5 = inlined_call_operand.vmem [shape: f32[3,32,16], index: 5, kind: input, shape index: {}]   ;;  %s1972_s6 = inlined_call_operand.vmem [shape: f32[3,1,16], index: 6, kind: input, shape index: {}]   ;;  %s1973_s7 = inlined_call_operand.vmem [shape: f32[3,32,16], index: 7, kind: input, shape index: {}]   ;;  %s1974_s8 = inlined_call_operand.vmem [shape: f32[3,1,16], index: 8, kind: input, shape index: {}]   ;;  %s1975_s9 = inlined_call_operand.vmem [shape: f32[3,1,16], index: 9, kind: input, shape index: {}]   ;;  %s1976_s10 = inlined_call_operand.vmem [shape: f32[3,1,16], index: 10, kind: input, shape index: {}]   ;;  %s1977_s11 = inlined_call_operand.hbm [shape: f32[8,16], index: 11, kind: output, shape index: {0}]   ;;  %s1978_s12 = inlined_call_operand.vmem [shape: f32[8,1], index: 12, kind: output, shape index: {1}]  }
   0x1   :  { %v42_v0 = vld [vmem:[%s1967_s1] sm:$0xff]  ;;  %v43_v1 = vld [vmem:[%s1967_s1 + $0x8] sm:$0xff]  ;;  %1504 = vmatprep.subr.bf16.mxu0 %v1613_v2  ;;  %1388 = vmatprep.mubr.msk.f32.mxu0 %vm1614_vm0, %v1615_v4 }
   0x2   :  { %v1505_v3 = vpack.c.bf16 %v43_v1, %v42_v0  ;;  %v126_v5 = vld [vmem:[%s1969_s3] sm:$0xff]  ;;  %v127_v6 = vld [vmem:[%s1969_s3 + $0x8] sm:$0xff]  ;;  %1507 = vmatprep.subr.bf16.mxu1 %v1613_v2  ;;  %1399 = vmatprep.mubr.msk.f32.mxu1 %vm1614_vm0, %v1615_v4 }
   0x3   :  { %v1508_v7 = vpack.c.bf16 %v127_v6, %v126_v5 }
   0x4   :  { %18 = vsyncpa [#allocation3], 0  ;;  %1506 = vmatpush3.bf16.msra.mxu0 %v1505_v3  ;;  %v1703_v8 = vld [vmem:[%s1966_s0] sm:$0xff]  ;;  %vm51_vm1 = vcmask 130048   ;;  %v128_v9 = vld [vmem:[%s1969_s3 + $0x10] sm:$0xff]  ;;  %vm137_vm2 = vcmask 261120  }
   0x5   :  { %1509 = vmatpush3.bf16.msra.mxu1 %v1508_v7  ;;  %1513 = vmatprep.subr.bf16.mxu0 %v1613_v2  ;;  %v129_v10 = vld [vmem:[%s1969_s3 + $0x18] sm:$0xff]  ;;  %v212_v12 = vld [vmem:[%s1971_s5] sm:$0xff]  ;;  %v213_v13 = vld [vmem:[%s1971_s5 + $0x8] sm:$0xff]  ;;  %vm429_vm3 = vcmask 122880   ;;  %s1616_s20 = smov [#allocation2]  }
   0x6   :  { %1510 = vmatprep.subr.bf16.mxu1 %v1613_v2  ;;  %v1511_v11 = vpack.c.bf16 %v129_v10, %v128_v9  ;;  %v1514_v14 = vpack.c.bf16 %v213_v13, %v212_v12  ;;  %v1263_v15 = vld [vmem:[%s1968_s2] ss:$0 sm:$0xff]  ;;  %v297_v17 = vld [vmem:[%s1973_s7 + $0x8] sm:$0xff]  ;;  %v214_v23 = vld [vmem:[%s1971_s5 + $0x10] sm:$0xff]  ;;  %s1251_s21 = sshll.u32 %s1616_s20, 4  ;;  %s1252_s21 = int_to_ptr.vmem [resolvable:$true] %s1251_s21 }
   0x7   :  { %1389 = vmatmul.mubr.msk.f32.vlgmr.msra.gmra.mrb[0].mxu0 %vm51_vm1, %v1703_v8  ;;  %v296_v16 = vld [vmem:[%s1973_s7] sm:$0xff]  ;;  %v215_v24 = vld [vmem:[%s1971_s5 + $0x18] sm:$0xff]  ;;  %v298_v25 = vld [vmem:[%s1973_s7 + $0x10] sm:$0xff]  ;;  %p1594_p1 = scmp.lt.s32.totalorder %s1252_s21, %s1252_s21 }
   0x8   :  { %1410 = vmatprep.mubr.msk.f32.mxu0 %vm1614_vm0, %v1615_v4  ;;  %1515 = vmatpush3.bf16.msra.mxu0 %v1514_v14  ;;  %v1520_v21 = vpack.c.bf16 %v297_v17, %v296_v16  ;;  %v1517_v26 = vpack.c.bf16 %v215_v24, %v214_v23  ;;  %v299_v27 = vld [vmem:[%s1973_s7 + $0x18] sm:$0xff]  ;;  %v1265_v29 = vld [vmem:[%s1970_s4] ss:$0 sm:$0xff]  ;;  %v1272_v34 = vld [vmem:[%s1967_s1 + $0x10] sm:$0xff] }
   0x9   :  { %1512 = vmatpush3.bf16.msra.mxu1 %v1511_v11  ;;  %1516 = vmatprep.subr.bf16.mxu0 %v1613_v2  ;;  %v1523_v28 = vpack.c.bf16 %v299_v27, %v298_v25  ;;  %v1273_v35 = vld [vmem:[%s1967_s1 + $0x18] sm:$0xff]  ;;  %v1269_v37 = vld [vmem:[%s1974_s8] ss:$0 sm:$0xff]  ;;  %v1278_v24 = vld [vmem:[%s1969_s3 + $0x28] sm:$0xff] }
   0xa   :  { %1519 = vmatprep.subr.bf16.mxu1 %v1613_v2  ;;  %v1526_v36 = vpack.c.bf16 %v1273_v35, %v1272_v34  ;;  %v1267_v46 = vld [vmem:[%s1972_s6] ss:$0 sm:$0xff]  ;;  %v1280_v27 = vld [vmem:[%s1969_s3 + $0x38] sm:$0xff]  ;;  %v1292_v34 = vld [vmem:[%s1973_s7 + $0x28] sm:$0xff] }
   0xb   :  { %v387_v10 = vld [vmem:[%s1975_s9] sm:$0x1] }
   0xc   :  { %1518 = vmatpush3.bf16.msra.mxu0 %v1517_v26  ;;  %v1277_v23 = vld [vmem:[%s1969_s3 + $0x20] sm:$0xff]  ;;  %v1279_v26 = vld [vmem:[%s1969_s3 + $0x30] sm:$0xff] }
   0xd   :  { %1525 = vmatprep.subr.bf16.mxu0 %v1613_v2  ;;  %v1529_v25 = vpack.c.bf16 %v1278_v24, %v1277_v23 }
  0xda   :  { %v121_v18 = vpop.f32.mrb[0].mxu0 }
  0xdb   :  { %v122_v19 = vadd.f32 %v1263_v15, %v121_v18  ;;  %v1390_v20 = vpop.f32.mrb[1].mxu0  ;;  %v416_v15 = vlaneseq }
  0xdc   :  { %v1271_v20 = vld [vmem:[%s1976_s10] ss:$0 sm:$0xff] }
  0xdd   :  { %v125_v22 = vmax.f32 %v122_v19, 0.0  ;;  %v417_v16 = vshrl.u32 %v416_v15, 7 }
  0xdf   :  { %1400 = vmatmul.mubr.msk.f32.vlgmr.msra.gmra.mrb[0].mxu1 %vm137_vm2, %v125_v22  ;;  %v1782_v17 = vsub.s32 0, %v417_v16 }
  0xe0   :  { %1521 = vmatpush3.bf16.msra.mxu1 %v1520_v21  ;;  %1421 = vmatprep.mubr.msk.f32.mxu1 %vm1614_vm0, %v1615_v4 }
  0xe1   :  { %1522 = vmatprep.subr.bf16.mxu1 %v1613_v2 }
  0xe4   :  { %1524 = vmatpush3.bf16.msra.mxu1 %v1523_v28  ;;  %v1532_v28 = vpack.c.bf16 %v1280_v27, %v1279_v26 }
  0xe5   :  { %1534 = vmatprep.subr.bf16.mxu1 %v1613_v2 }
 0x1b2   :  { %v207_v30 = vpop.f32.mrb[0].mxu1 }
 0x1b3   :  { %v208_v31 = vadd.f32 %v1265_v29, %v207_v30  ;;  %v1401_v32 = vpop.f32.mrb[1].mxu1  ;;  %v1284_v29 = vld [vmem:[%s1971_s5 + $0x20] sm:$0xff]  ;;  %v1285_v30 = vld [vmem:[%s1971_s5 + $0x28] sm:$0xff] }
 0x1b4   :  { %v1275_v32 = vld [vmem:[%s1968_s2 + $0x1] ss:$0 sm:$0xff] }
 0x1b5   :  { %v211_v33 = vmax.f32 %v208_v31, 0.0  ;;  %v1535_v31 = vpack.c.bf16 %v1285_v30, %v1284_v29 }
 0x1b7   :  { %1411 = vmatmul.mubr.msk.f32.vlgmr.msra.gmra.mrb[2].mxu0 %vm137_vm2, %v211_v33  ;;  %1422 = vmatmul.mubr.msk.f32.vlgmr.msra.gmra.mrb[2].mxu1 %vm137_vm2, %v211_v33  ;;  %v1291_v33 = vld [vmem:[%s1973_s7 + $0x20] sm:$0xff] }
 0x1b8   :  { %1428 = vmatprep.mubr.msk.f32.mxu0 %vm1614_vm0, %v1615_v4  ;;  %1450 = vmatprep.mubr.msk.f32.mxu1 %vm1614_vm0, %v1615_v4 }
 0x1b9   :  { %1527 = vmatpush3.bf16.msra.mxu0 %v1526_v36  ;;  %1536 = vmatpush3.bf16.msra.mxu1 %v1535_v31 }
 0x1ba   :  { %1528 = vmatprep.subr.bf16.mxu0 %v1613_v2  ;;  %1537 = vmatprep.subr.bf16.mxu1 %v1613_v2 }
 0x28a   :  { %v292_v38 = vpop.f32.mrb[2].mxu0  ;;  %v373_v39 = vpop.f32.mrb[2].mxu1 }
 0x28b   :  { %v374_v40 = vadd.f32 %v1269_v37, %v373_v39  ;;  %v1412_v41 = vpop.f32.mrb[3].mxu0  ;;  %v1423_v42 = vpop.f32.mrb[3].mxu1  ;;  %v293_v47 = vadd.f32 %v1267_v46, %v292_v38  ;;  %v1541_v38 = vpack.c.bf16 %v1292_v34, %v1291_v33  ;;  %v1282_v46 = vld [vmem:[%s1970_s4 + $0x1] ss:$0 sm:$0xff] }
 0x28c   :  { %v1287_v41 = vld [vmem:[%s1971_s5 + $0x38] sm:$0xff]  ;;  %v1293_v42 = vld [vmem:[%s1973_s7 + $0x30] sm:$0xff] }
 0x28d   :  { %v378_v43 = vmul.f32 0.5, %v374_v40  ;;  %v382_v44 = vsel %vm51_vm1, %v374_v40, 0.0  ;;  %v377_v48 = vsub.f32 %v1703_v8, %v293_v47  ;;  %v1286_v40 = vld [vmem:[%s1971_s5 + $0x30] sm:$0xff] }
 0x28e   :  { %383 = vadd.xlane.f32.xlu0 %v382_v44  ;;  %v1294_v44 = vld [vmem:[%s1973_s7 + $0x38] sm:$0xff] }
 0x28f   :  { %v379_v45 = vmul.f32 1.442695, %v378_v43  ;;  %v1538_v43 = vpack.c.bf16 %v1287_v41, %v1286_v40  ;;  %v1308_v41 = vld [vmem:[%s1969_s3 + $0x50] sm:$0xff] }
 0x291   :  { %1571 = vpow2.f32 %v379_v45  ;;  %v1544_v45 = vpack.c.bf16 %v1294_v44, %v1293_v42  ;;  %1539 = vmatpush3.bf16.msra.mxu1 %v1538_v43  ;;  %v1309_v42 = vld [vmem:[%s1969_s3 + $0x58] sm:$0xff]  ;;  %v1313_v44 = vld [vmem:[%s1971_s5 + $0x40] sm:$0xff] }
 0x292   :  { %1546 = vmatprep.subr.bf16.mxu1 %v1613_v2  ;;  %v1553_v43 = vpack.c.bf16 %v1309_v42, %v1308_v41 }
 0x29b   :  { %v1572_v49 = vpop.eup %1571 }
 0x29c   :  { %v381_v50 = vmul.f32 %v1572_v49, %v377_v48 }
 0x29e   :  { %v389_v51 = vsel %vm51_vm1, %v381_v50, 0.0 }
 0x29f   :  { %v390_v52 = vrot.slane %v389_v51, 4 }
 0x2a1   :  { %v391_v53 = vadd.f32 %v390_v52, %v389_v51  ;;  %v1301_v51 = vld [vmem:[%s1967_s1 + $0x20] sm:$0xff]  ;;  %v1302_v52 = vld [vmem:[%s1967_s1 + $0x28] sm:$0xff] }
 0x2a3   :  { %v392_v54 = vrot.slane %v391_v53, 2 }
 0x2a5   :  { %v393_v55 = vadd.f32 %v392_v54, %v391_v53  ;;  %v1547_v53 = vpack.c.bf16 %v1302_v52, %v1301_v51  ;;  %v1296_v54 = vld [vmem:[%s1974_s8 + $0x1] ss:$0 sm:$0xff] }
 0x2a7   :  { %v394_v56 = vrot.slane %v393_v55, 1 }
 0x2a9   :  { %v395_v57 = vadd.f32 %v394_v56, %v393_v55 }
 0x2ab   :  { %v397_v58 = vmul.f32 0.125, %v395_v57 }
 0x2ad   :  { %v398_v59 = vsub.f32 %v381_v50, %v397_v58 }
 0x2af   :  { %v399_v60 = vmul.f32 %v398_v59, %v398_v59 }
 0x2b1   :  { %v400_v61 = vsel %vm51_vm1, %v399_v60, 0.0 }
 0x2b2   :  { %v401_v62 = vrot.slane %v400_v61, 4 }
 0x2b4   :  { %v402_v63 = vadd.f32 %v401_v62, %v400_v61 }
 0x2b6   :  { %v403_v0 = vrot.slane %v402_v63, 2 }
 0x2b8   :  { %v404_v1 = vadd.f32 %v403_v0, %v402_v63  ;;  %v1289_v63 = vld [vmem:[%s1972_s6 + $0x1] ss:$0 sm:$0xff] }
 0x2ba   :  { %v405_v3 = vrot.slane %v404_v1, 1 }
 0x2bc   :  { %v406_v5 = vadd.f32 %v405_v3, %v404_v1 }
 0x2be   :  { %v407_v6 = vmul.f32 0.14285715, %v406_v5 }
 0x2c0   :  { %v408_v7 = vadd.f32 1e-05, %v407_v6 }
 0x2c2   :  { %1573 = vlog2.f32 %v408_v7 }
 0x2cc   :  { %v1574_v8 = vpop.eup %1573 }
 0x2cd   :  { %v410_v9 = vmul.f32 0.6931472, %v1574_v8 }
 0x2cf   :  { %v411_v11 = vmul.f32 0.5, %v410_v9 }
 0x2d1   :  { %v412_v12 = vsub.f32 %v387_v10, %v411_v11 }
 0x2d3   :  { %v430_v13 = vsel %vm429_vm3, %v412_v12, 0.0  ;;  %v413_v14 = vmul.f32 1.442695, %v412_v12 }
 0x2d4   :  { %431 = vadd.xlane.f32.xlu0 %v430_v13 }
 0x2d5   :  { %1575 = vpow2.f32 %v413_v14 }
 0x2df   :  { %v1576_v18 = vpop.eup %1575 }
 0x2e0   :  { %v419_v19 = vrot.slane %v1576_v18, %v1782_v17 }
 0x2e2   :  { %v421_v21 = vmul.f32 %v419_v19, %v398_v59 }
 0x2e4   :  { %v1788_v22 = vadd.f32 %v1271_v20, %v421_v21 }
 0x2e6   :  { %1429 = vmatmul.mubr.msk.f32.vlgmr.msra.gmra.mrb[4].mxu0 %vm51_vm1, %v1788_v22 }
 0x2e7   :  { %1530 = vmatpush3.bf16.msra.mxu0 %v1529_v25  ;;  %1439 = vmatprep.mubr.msk.f32.mxu0 %vm1614_vm0, %v1615_v4 }
 0x2e8   :  { %1531 = vmatprep.subr.bf16.mxu0 %v1613_v2 }
 0x2eb   :  { %1533 = vmatpush3.bf16.msra.mxu0 %v1532_v28  ;;  %v1298_v28 = vld [vmem:[%s1975_s9 + $0x1] sm:$0x1] }
 0x2ec   :  { %1540 = vmatprep.subr.bf16.mxu0 %v1613_v2 }
 0x3b9   :  { %v518_v35 = vpop.f32.mrb[4].mxu0 }
 0x3ba   :  { %v519_v36 = vadd.f32 %v1275_v32, %v518_v35  ;;  %v1430_v37 = vpop.f32.mrb[5].mxu0  ;;  %v1300_v35 = vld [vmem:[%s1976_s10 + $0x1] ss:$0 sm:$0xff] }
 0x3bc   :  { %v522_v39 = vmax.f32 %v519_v36, 0.0 }
 0x3be   :  { %1440 = vmatmul.mubr.msk.f32.vlgmr.msra.gmra.mrb[6].mxu0 %vm137_vm2, %v522_v39  ;;  %v1307_v39 = vld [vmem:[%s1969_s3 + $0x48] sm:$0xff] }
 0x3bf   :  { %1542 = vmatpush3.bf16.msra.mxu0 %v1541_v38  ;;  %1461 = vmatprep.mubr.msk.f32.mxu0 %vm1614_vm0, %v1615_v4  ;;  %v1306_v38 = vld [vmem:[%s1969_s3 + $0x40] sm:$0xff] }
 0x3c0   :  { %1543 = vmatprep.subr.bf16.mxu0 %v1613_v2  ;;  %v1550_v40 = vpack.c.bf16 %v1307_v39, %v1306_v38  ;;  %v1327_v38 = vld [vmem:[%s1975_s9 + $0x2] sm:$0x1]  ;;  %s1589_s9 = scalar_lea.vmem %s1252_s21, 128 }
 0x3c1   :  { %p1590_p0 = scmp.ne.s32.totalorder %s1252_s21, %s1589_s9  ;;  %p1595_p2 = scmp.lt.s32.totalorder %s1589_s9, %s1589_s9 }
 0x3c3   :  { %1545 = vmatpush3.bf16.msra.mxu0 %v1544_v45  ;;  %v1314_v45 = vld [vmem:[%s1971_s5 + $0x48] sm:$0xff]  ;;  %p1596_p3 = por %p1595_p2, %p1594_p1 }
 0x3c4   :  { %1555 = vmatprep.subr.bf16.mxu0 %v1613_v2 }
 0x3c5   :  { %p1597_p4 = pnand %p1596_p3, %p1590_p0 }
 0x491   :  { %v605_v47 = vpop.f32.mrb[6].mxu0 }
 0x492   :  { %v606_v48 = vadd.f32 %v1282_v46, %v605_v47  ;;  %v1441_v49 = vpop.f32.mrb[7].mxu0  ;;  %v1556_v46 = vpack.c.bf16 %v1314_v45, %v1313_v44  ;;  %v1304_v47 = vld [vmem:[%s1968_s2 + $0x2] ss:$0 sm:$0xff] }
 0x493   :  { %v1321_v49 = vld [vmem:[%s1973_s7 + $0x48] sm:$0xff]  ;;  %v1329_v45 = vld [vmem:[%s1976_s10 + $0x2] ss:$0 sm:$0xff] }
 0x494   :  { %v609_v50 = vmax.f32 %v606_v48, 0.0  ;;  %v1320_v48 = vld [vmem:[%s1973_s7 + $0x40] sm:$0xff] }
 0x496   :  { %1451 = vmatmul.mubr.msk.f32.vlgmr.msra.gmra.mrb[4].mxu1 %vm137_vm2, %v609_v50  ;;  %1462 = vmatmul.mubr.msk.f32.vlgmr.msra.gmra.mrb[8].mxu0 %vm137_vm2, %v609_v50 }
 0x497   :  { %1468 = vmatprep.mubr.msk.f32.mxu1 %vm1614_vm0, %v1615_v4  ;;  %1490 = vmatprep.mubr.msk.f32.mxu0 %vm1614_vm0, %v1615_v4 }
 0x498   :  { %1548 = vmatpush3.bf16.msra.mxu1 %v1547_v53  ;;  %1557 = vmatpush3.bf16.msra.mxu0 %v1556_v46  ;;  %v1562_v53 = vpack.c.bf16 %v1321_v49, %v1320_v48 }
 0x499   :  { %1549 = vmatprep.subr.bf16.mxu1 %v1613_v2  ;;  %1558 = vmatprep.subr.bf16.mxu0 %v1613_v2 }
 0x569   :  { %v692_v55 = vpop.f32.mrb[4].mxu1  ;;  %v775_v56 = vpop.f32.mrb[8].mxu0 }
 0x56a   :  { %v776_v57 = vadd.f32 %v1296_v54, %v775_v56  ;;  %v1452_v58 = vpop.f32.mrb[5].mxu1  ;;  %v1463_v59 = vpop.f32.mrb[9].mxu0  ;;  %v693_v0 = vadd.f32 %v1289_v63, %v692_v55  ;;  %v1315_v55 = vld [vmem:[%s1971_s5 + $0x50] sm:$0xff]  ;;  %v1316_v56 = vld [vmem:[%s1971_s5 + $0x58] sm:$0xff] }
 0x56b   :  { %v1559_v58 = vpack.c.bf16 %v1316_v56, %v1315_v55  ;;  %v1323_v59 = vld [vmem:[%s1973_s7 + $0x58] sm:$0xff] }
 0x56c   :  { %v780_v60 = vmul.f32 0.5, %v776_v57  ;;  %v784_v61 = vsel %vm51_vm1, %v776_v57, 0.0  ;;  %v779_v1 = vsub.f32 %v1788_v22, %v693_v0  ;;  %v1322_v57 = vld [vmem:[%s1973_s7 + $0x50] sm:$0xff]  ;;  %v1325_v0 = vld [vmem:[%s1974_s8 + $0x2] ss:$0 sm:$0xff] }
 0x56d   :  { %785 = vadd.xlane.f32.xlu1 %v784_v61  ;;  %1560 = vmatpush3.bf16.msra.mxu0 %v1559_v58 }
 0x56e   :  { %v781_v62 = vmul.f32 1.442695, %v780_v60 }
 0x570   :  { %1577 = vpow2.f32 %v781_v62 }
 0x57a   :  { %v1578_v3 = vpop.eup %1577 }
 0x57b   :  { %v783_v5 = vmul.f32 %v1578_v3, %v779_v1 }
 0x57d   :  { %v793_v6 = vsel %vm51_vm1, %v783_v5, 0.0 }
 0x57e   :  { %v794_v7 = vrot.slane %v793_v6, 4 }
 0x580   :  { %v795_v8 = vadd.f32 %v794_v7, %v793_v6 }
 0x582   :  { %v796_v9 = vrot.slane %v795_v8, 2 }
 0x584   :  { %v797_v10 = vadd.f32 %v796_v9, %v795_v8 }
 0x586   :  { %v798_v11 = vrot.slane %v797_v10, 1 }
 0x588   :  { %v799_v12 = vadd.f32 %v798_v11, %v797_v10  ;;  %v1318_v11 = vld [vmem:[%s1972_s6 + $0x2] ss:$0 sm:$0xff] }
 0x58a   :  { %v800_v13 = vmul.f32 0.125, %v799_v12 }
 0x58c   :  { %v801_v14 = vsub.f32 %v783_v5, %v800_v13 }
 0x58e   :  { %v802_v15 = vmul.f32 %v801_v14, %v801_v14 }
 0x590   :  { %v803_v16 = vsel %vm51_vm1, %v802_v15, 0.0 }
 0x591   :  { %v804_v18 = vrot.slane %v803_v16, 4 }
 0x593   :  { %v805_v19 = vadd.f32 %v804_v18, %v803_v16 }
 0x595   :  { %v806_v20 = vrot.slane %v805_v19, 2 }
 0x597   :  { %v807_v21 = vadd.f32 %v806_v20, %v805_v19 }
 0x599   :  { %v808_v22 = vrot.slane %v807_v21, 1 }
 0x59b   :  { %v809_v23 = vadd.f32 %v808_v22, %v807_v21 }
 0x59d   :  { %v810_v24 = vmul.f32 0.14285715, %v809_v23 }
 0x59f   :  { %v811_v25 = vadd.f32 1e-05, %v810_v24 }
 0x5a1   :  { %1579 = vlog2.f32 %v811_v25 }
 0x5ab   :  { %v1580_v26 = vpop.eup %1579 }
 0x5ac   :  { %v813_v27 = vmul.f32 0.6931472, %v1580_v26 }
 0x5ae   :  { %v814_v29 = vmul.f32 0.5, %v813_v27 }
 0x5b0   :  { %v815_v30 = vsub.f32 %v1298_v28, %v814_v29 }
 0x5b2   :  { %v832_v31 = vsel %vm429_vm3, %v815_v30, 0.0  ;;  %v816_v32 = vmul.f32 1.442695, %v815_v30 }
 0x5b3   :  { %833 = vadd.xlane.f32.xlu1 %v832_v31 }
 0x5b4   :  { %1581 = vpow2.f32 %v816_v32 }
 0x5be   :  { %v1582_v33 = vpop.eup %1581 }
 0x5bf   :  { %v822_v34 = vrot.slane %v1582_v33, %v1782_v17 }
 0x5c1   :  { %v824_v36 = vmul.f32 %v822_v34, %v801_v14 }
 0x5c3   :  { %v831_v37 = vadd.f32 %v1300_v35, %v824_v36 }
 0x5c5   :  { %1469 = vmatmul.mubr.msk.f32.vlgmr.msra.gmra.mrb[6].mxu1 %vm51_vm1, %v831_v37 }
 0x5c6   :  { %1551 = vmatpush3.bf16.msra.mxu1 %v1550_v40  ;;  %1479 = vmatprep.mubr.msk.f32.mxu1 %vm1614_vm0, %v1615_v4 }
 0x5c7   :  { %1552 = vmatprep.subr.bf16.mxu1 %v1613_v2 }
 0x5ca   :  { %1554 = vmatpush3.bf16.msra.mxu1 %v1553_v43 }
 0x5cb   :  { %1561 = vmatprep.subr.bf16.mxu1 %v1613_v2 }
 0x698   :  { %v920_v50 = vpop.f32.mrb[6].mxu1 }
 0x699   :  { %v921_v51 = vadd.f32 %v1304_v47, %v920_v50  ;;  %v1470_v52 = vpop.f32.mrb[7].mxu1 }
 0x69b   :  { %v924_v54 = vmax.f32 %v921_v51, 0.0 }
 0x69d   :  { %1480 = vmatmul.mubr.msk.f32.vlgmr.msra.gmra.mrb[8].mxu1 %vm137_vm2, %v924_v54 }
 0x69e   :  { %1563 = vmatpush3.bf16.msra.mxu1 %v1562_v53  ;;  %1501 = vmatprep.mubr.msk.f32.mxu1 %vm1614_vm0, %v1615_v4  ;;  %v1565_v4 = vpack.c.bf16 %v1323_v59, %v1322_v57 }
 0x69f   :  { %1564 = vmatprep.subr.bf16.mxu1 %v1613_v2  ;;  %v1311_v2 = vld [vmem:[%s1970_s4 + $0x2] ss:$0 sm:$0xff] }
 0x6a2   :  { %1566 = vmatpush3.bf16.msra.mxu1 %v1565_v4 }
 0x770   :  { %v1007_v60 = vpop.f32.mrb[8].mxu1 }
 0x771   :  { %v1008_v61 = vadd.f32 %v1311_v2, %v1007_v60  ;;  %v1481_v62 = vpop.f32.mrb[9].mxu1 }
 0x773   :  { %v1011_v63 = vmax.f32 %v1008_v61, 0.0 }
 0x775   :  { %1491 = vmatmul.mubr.msk.f32.vlgmr.msra.gmra.mrb[10].mxu0 %vm137_vm2, %v1011_v63  ;;  %1502 = vmatmul.mubr.msk.f32.vlgmr.msra.gmra.mrb[10].mxu1 %vm137_vm2, %v1011_v63 }
 0x848   :  { %v1094_v1 = vpop.f32.mrb[10].mxu0  ;;  %v1177_v3 = vpop.f32.mrb[10].mxu1 }
 0x849   :  { %v1178_v5 = vadd.f32 %v1325_v0, %v1177_v3  ;;  %v1492_v6 = vpop.f32.mrb[11].mxu0  ;;  %v1503_v7 = vpop.f32.mrb[11].mxu1  ;;  %v1095_v12 = vadd.f32 %v1318_v11, %v1094_v1 }
 0x84b   :  { %v1182_v8 = vmul.f32 0.5, %v1178_v5  ;;  %v1186_v9 = vsel %vm51_vm1, %v1178_v5, 0.0  ;;  %v1181_v13 = vsub.f32 %v831_v37, %v1095_v12 }
 0x84c   :  { %1187 = vadd.xlane.f32.xlu0 %v1186_v9 }
 0x84d   :  { %v1183_v10 = vmul.f32 1.442695, %v1182_v8 }
 0x84f   :  { %1583 = vpow2.f32 %v1183_v10 }
 0x859   :  { %v1584_v14 = vpop.eup %1583 }
 0x85a   :  { %v1185_v15 = vmul.f32 %v1584_v14, %v1181_v13 }
 0x85c   :  { %v1195_v16 = vsel %vm51_vm1, %v1185_v15, 0.0 }
 0x85d   :  { %v1196_v18 = vrot.slane %v1195_v16, 4 }
 0x85f   :  { %v1197_v19 = vadd.f32 %v1196_v18, %v1195_v16 }
 0x861   :  { %v1198_v20 = vrot.slane %v1197_v19, 2 }
 0x863   :  { %v1199_v21 = vadd.f32 %v1198_v20, %v1197_v19 }
 0x865   :  { %v1200_v22 = vrot.slane %v1199_v21, 1 }
 0x867   :  { %v1201_v23 = vadd.f32 %v1200_v22, %v1199_v21 }
 0x869   :  { %v1202_v24 = vmul.f32 0.125, %v1201_v23 }
 0x86b   :  { %v1203_v25 = vsub.f32 %v1185_v15, %v1202_v24 }
 0x86d   :  { %v1204_v26 = vmul.f32 %v1203_v25, %v1203_v25 }
 0x86f   :  { %v1205_v27 = vsel %vm51_vm1, %v1204_v26, 0.0 }
 0x870   :  { %v1206_v28 = vrot.slane %v1205_v27, 4 }
 0x872   :  { %v1207_v29 = vadd.f32 %v1206_v28, %v1205_v27 }
 0x874   :  { %v1208_v30 = vrot.slane %v1207_v29, 2 }
 0x876   :  { %v1209_v31 = vadd.f32 %v1208_v30, %v1207_v29 }
 0x878   :  { %v1210_v32 = vrot.slane %v1209_v31, 1 }
 0x87a   :  { %v1211_v33 = vadd.f32 %v1210_v32, %v1209_v31 }
 0x87c   :  { %v1212_v34 = vmul.f32 0.14285715, %v1211_v33 }
 0x87e   :  { %v1213_v35 = vadd.f32 1e-05, %v1212_v34 }
 0x880   :  { %1585 = vlog2.f32 %v1213_v35 }
 0x88a   :  { %v1586_v36 = vpop.eup %1585 }
 0x88b   :  { %v1215_v37 = vmul.f32 0.6931472, %v1586_v36 }
 0x88d   :  { %v1216_v39 = vmul.f32 0.5, %v1215_v37 }
 0x88f   :  { %v1217_v40 = vsub.f32 %v1327_v38, %v1216_v39 }
 0x891   :  { %v1234_v41 = vsel %vm429_vm3, %v1217_v40, 0.0  ;;  %v1218_v42 = vmul.f32 1.442695, %v1217_v40 }
 0x892   :  { %1235 = vadd.xlane.f32.xlu1 %v1234_v41 }
 0x893   :  { %1587 = vpow2.f32 %v1218_v42 }
 0x89d   :  { %v1588_v43 = vpop.eup %1587 }
 0x89e   :  { %v1224_v44 = vrot.slane %v1588_v43, %v1782_v17 }
 0x8a0   :  { %v1226_v46 = vmul.f32 %v1224_v44, %v1203_v25 }
 0x8a2   :  { %v1233_v47 = vadd.f32 %v1329_v45, %v1226_v46 }
 0x8a4   :  { %1242 = vst.msk [vmem:[#allocation2] sm:$0xff] %vm51_vm1, %v1233_v47 }
 0x8a5   :  { %1600 = shalt.err (!%p1597_p4)
}
 0x8a6   :  { %s1601_s24 = scalar_lea.hbm %s1977_s11, 128 }
 0x8a7   :  { %p1602_p5 = scmp.ne.s32.totalorder %s1977_s11, %s1601_s24  ;;  %p1605_p6 = scmp.lt.u32.totalorder %s1601_s24, %s1977_s11 }
 0x8a9   :  { %p1607_p7 = pnand %p1605_p6, %p1602_p5 }
 0x8ab   :  { %1610 = shalt.err (!%p1607_p7)
}
 0x8ac   :  { %1254 = dma.vmem_to_hbm [thread:$0]  %s1252_s21, 128, %s1977_s11, [#allocation3]   ;;  %v384_v48 = vpop.xlane.xlu0 %383  ;;  %v786_v50 = vpop.xlane.xlu1 %785  ;;  %vm1243_vm4 = vcmask 7168  }
 0x8ad   :  { %v385_v53 = vmul.f32 0.5, %v384_v48  ;;  %v787_v54 = vmul.f32 0.5, %v786_v50 }
 0x8b0   :  { %v432_v49 = vpop.xlane.xlu0 %431  ;;  %v834_v52 = vpop.xlane.xlu1 %833 }
 0x8b1   :  { %v436_v51 = vrot.slane %v432_v49, %v1782_v17  ;;  %v838_v57 = vrot.slane %v834_v52, %v1782_v17 }
 0x8b3   :  { %v437_v56 = vadd.f32 %v436_v51, %v385_v53 }
 0x8b5   :  { %v788_v58 = vadd.f32 %v787_v54, %v437_v56 }
 0x8b7   :  { %v839_v4 = vadd.f32 %v838_v57, %v788_v58 }
 0x8d9   :  { %v1188_v55 = vpop.xlane.xlu0 %1187 }
 0x8da   :  { %v1189_v59 = vmul.f32 0.5, %v1188_v55 }
 0x8dc   :  { %v1190_v60 = vadd.f32 %v1189_v59, %v839_v4 }
 0x91f   :  { %v1236_v2 = vpop.xlane.xlu1 %1235 }
 0x920   :  { %v1240_v61 = vrot.slane %v1236_v2, %v1782_v17 }
 0x922   :  { %v1241_v62 = vadd.f32 %v1240_v61, %v1190_v60 }
 0x924   :  { %1244 = vst.msk [vmem:[%s1978_s12] sm:$0xff] %vm1243_vm4, %v1241_v62 }
 0x925   :  { %1611 = dma.done.wait [#allocation3], 128  }
 0x926   :  { %1612 = vsyncadd [#allocation3], 4294967168 }
 0x927   :  { %1262 = vsyncpa [#allocation3], 1 }

</bundles_post_ra>
